<compile_context>
chip_gen: v5e
topology: v5e:2x2
jax: 0.10.0
libtpu: 0.0.40
codegen_flags: <defaults>
</compile_context>

<pallas_src>
import jax
import jax.numpy as jnp
from jax.experimental import pallas as pl
from jax.experimental.pallas import tpu as pltpu


def _cdiv(a: int, b: int) -> int:
    return (a + b - 1) // b


def _round_up(n: int, m: int) -> int:
    return _cdiv(n, m) * m


def _vmem_capacity_bytes() -> int:
    try:
        return int(pltpu.get_tpu_info().vmem_capacity_bytes)
    except Exception:
        return 64 << 20  # conservative fallback (v7x per-TensorCore VMEM)


def _sublane_granule(dtype) -> int:
    return {4: 8, 2: 16, 1: 32}.get(jnp.dtype(dtype).itemsize, 8)


# ----------------------------------------------------------------------------
# One-time parameter preparation (hoisted out of the per-call path).
# ----------------------------------------------------------------------------
def prepare_params(w1, b1, w2, b2, *, compute_dtype=jnp.float32,
                   h_tile=None, max_resident_weight_bytes=None):
    """w1: (input_size, hidden); b1: (hidden,); w2: (hidden, num_classes); b2: (num_classes,).

    Returns an opaque params tuple consumed by simple_classifier(). If the
    weights are too large to keep VMEM-resident (or h_tile is given), hidden is
    padded to a multiple of h_tile and the call uses the reduction-tiled path.
    """
    in_f, hidden = w1.shape
    hidden2, num_classes = w2.shape
    assert hidden == hidden2, "w1/w2 hidden dims must match"
    cdt = jnp.dtype(compute_dtype)

    weight_bytes = (in_f * hidden + hidden * num_classes) * cdt.itemsize
    if max_resident_weight_bytes is None:
        # Leave room for double-buffered x/out tiles and the hidden
        # intermediate; the pipeliner holds 2 copies of each "resident" block.
        max_resident_weight_bytes = _vmem_capacity_bytes() // 4
    if h_tile is None and 2 * weight_bytes > max_resident_weight_bytes:
        h_tile = 512  # default reduction tile over the hidden dim
    if h_tile is not None:
        h_tile = max(128, _round_up(int(h_tile), 128))
        hidden_p = _round_up(hidden, h_tile)
    else:
        hidden_p = hidden

    b1 = jnp.reshape(b1, (1, hidden)).astype(jnp.float32)
    b2 = jnp.reshape(b2, (1, num_classes)).astype(jnp.float32)
    w1 = w1.astype(cdt)
    w2 = w2.astype(cdt)
    if hidden_p != hidden:  # only pad when the reduction-tiled path needs it
        w1 = jnp.zeros((in_f, hidden_p), cdt).at[:, :hidden].set(w1)
        w2 = jnp.zeros((hidden_p, num_classes), cdt).at[:hidden, :].set(w2)
        b1 = jnp.zeros((1, hidden_p), jnp.float32).at[:, :hidden].set(b1)

    meta = dict(in_features=in_f, hidden=hidden, hidden_p=hidden_p,
                num_classes=num_classes, h_tile=h_tile, compute_dtype=cdt)
    return (w1, b1, w2, b2, meta)


# ----------------------------------------------------------------------------
# Kernels
# ----------------------------------------------------------------------------
def _mlp_kernel_resident(x_ref, w1_ref, b1_ref, w2_ref, b2_ref, o_ref):
    # fc1 on the MXU with f32 accumulation; bias + ReLU in f32 on the VPU.
    h = jnp.dot(x_ref[...], w1_ref[...], preferred_element_type=jnp.float32)
    h = jnp.maximum(h + b1_ref[...], 0.0)
    # fc2 (cast back to the matmul dtype; no-op in pure-f32 mode).
    out = jnp.dot(h.astype(w2_ref.dtype), w2_ref[...],
                  preferred_element_type=jnp.float32)
    o_ref[...] = (out + b2_ref[...]).astype(o_ref.dtype)


def _mlp_kernel_htiled(x_ref, w1_ref, b1_ref, w2_ref, b2_ref, o_ref, acc_ref):
    # Reduction over hidden tiles: relu() is column-wise, so
    # relu(x@W1+b1) @ W2 == sum_j relu(x@W1[:,j] + b1[j]) @ W2[j,:].
    j = pl.program_id(1)

    @pl.when(j == 0)
    def _():
        acc_ref[...] = jnp.zeros_like(acc_ref)

    h = jnp.dot(x_ref[...], w1_ref[...], preferred_element_type=jnp.float32)
    h = jnp.maximum(h + b1_ref[...], 0.0)
    acc_ref[...] += jnp.dot(h.astype(w2_ref.dtype), w2_ref[...],
                            preferred_element_type=jnp.float32)

    @pl.when(j == pl.num_programs(1) - 1)
    def _():
        o_ref[...] = (acc_ref[...] + b2_ref[...]).astype(o_ref.dtype)


# ----------------------------------------------------------------------------
# Per-call wrapper
# ----------------------------------------------------------------------------
def simple_classifier(x, params, *, block_batch=None):
    """x: (B, input_size); params: output of prepare_params(). Returns (B, num_classes) f32."""
    w1, b1, w2, b2, meta = params
    in_f = meta["in_features"]
    hidden_p = meta["hidden_p"]
    num_classes = meta["num_classes"]
    h_tile = meta["h_tile"]
    cdt = meta["compute_dtype"]

    B, xf = x.shape
    assert xf == in_f, "input feature dim mismatch"

    vmem_cap = _vmem_capacity_bytes()
    big_vmem = vmem_cap >= (96 << 20)             # v5e / v6e (128 MiB VMEM)
    if block_batch is None:
        block_batch = 512 if big_vmem else 256    # tighter on v7x (64 MiB/TC)

    granule = _sublane_granule(cdt)
    if B <= block_batch:
        TB = B                                    # single full-dim batch tile
    else:
        # Even split rounded to the sublane granule -> minimal batch padding.
        TB = _round_up(_cdiv(B, _cdiv(B, block_batch)), granule)

    th = h_tile if h_tile is not None else hidden_p

    def vmem_bytes(tb):
        return (
            2 * tb * in_f * cdt.itemsize                           # x tile (2-deep)
            + 2 * tb * num_classes * 4                             # out tile (f32, 2-deep)
            + 2 * (in_f * th + th * num_classes) * cdt.itemsize    # weight blocks (default 2-deep)
            + 2 * (th + num_classes) * 4                           # bias blocks
            + tb * th * 4                                          # hidden intermediate (f32)
            + (tb * num_classes * 4 if h_tile is not None else 0)  # f32 accumulator scratch
        )

    budget = int(vmem_cap * (0.75 if big_vmem else 0.6))
    while TB > granule and vmem_bytes(TB) > budget:
        new_tb = max(granule, _round_up(TB // 2, granule))
        if new_tb == TB:
            break
        TB = new_tb

    if TB >= B:
        TB, B_P = B, B
    else:
        B_P = _round_up(B, TB)

    # Per-call batch prep only (weights were prepared once in prepare_params).
    if B_P == B and x.dtype == cdt:
        xp = x
    elif B_P == B:
        xp = x.astype(cdt)
    else:
        xp = jnp.zeros((B_P, in_f), cdt).at[:B, :].set(x.astype(cdt))

    need = vmem_bytes(TB)
    vmem_limit = int(min(max(2 * need, 8 << 20), budget))
    if vmem_limit < need + (1 << 20):
        vmem_limit = int(min(need + (4 << 20), int(0.9 * vmem_cap)))

    nb = B_P // TB
    out_shape = jax.ShapeDtypeStruct((B_P, num_classes), jnp.float32)

    if h_tile is None:
        out = pl.pallas_call(
            _mlp_kernel_resident,
            out_shape=out_shape,
            grid=(nb,),
            in_specs=[
                pl.BlockSpec((TB, in_f), lambda i: (i, 0)),               # x: streamed over batch
                pl.BlockSpec((in_f, hidden_p), lambda i: (0, 0)),         # w1: VMEM-resident
                pl.BlockSpec((1, hidden_p), lambda i: (0, 0)),            # b1: resident
                pl.BlockSpec((hidden_p, num_classes), lambda i: (0, 0)),  # w2: resident
                pl.BlockSpec((1, num_classes), lambda i: (0, 0)),         # b2: resident
            ],
            out_specs=pl.BlockSpec((TB, num_classes), lambda i: (i, 0)),
            compiler_params=pltpu.CompilerParams(
                dimension_semantics=("parallel",),
                vmem_limit_bytes=vmem_limit,
            ),
        )(xp, w1, b1, w2, b2)
    else:
        nh = hidden_p // h_tile
        out = pl.pallas_call(
            _mlp_kernel_htiled,
            out_shape=out_shape,
            grid=(nb, nh),
            in_specs=[
                pl.BlockSpec((TB, in_f), lambda i, j: (i, 0)),              # x (same block across j)
                pl.BlockSpec((in_f, h_tile), lambda i, j: (0, j)),          # w1 columns tile
                pl.BlockSpec((1, h_tile), lambda i, j: (0, j)),             # b1 tile
                pl.BlockSpec((h_tile, num_classes), lambda i, j: (j, 0)),   # w2 rows tile
                pl.BlockSpec((1, num_classes), lambda i, j: (0, 0)),        # b2
            ],
            out_specs=pl.BlockSpec((TB, num_classes), lambda i, j: (i, 0)),
            scratch_shapes=[pltpu.VMEM((TB, num_classes), jnp.float32)],
            compiler_params=pltpu.CompilerParams(
                dimension_semantics=("parallel", "arbitrary"),
                vmem_limit_bytes=vmem_limit,
            ),
        )(xp, w1, b1, w2, b2)

    return out if B_P == B else out[:B]


# ----------------------------------------------------------------------------
# Demo / correctness checks
# ----------------------------------------------------------------------------
if __name__ == "__main__":
    def make_problem(key, batch, input_size, hidden_size, num_classes):
        kx, kw1, kb1, kw2, kb2 = jax.random.split(key, 5)
        x = jax.random.normal(kx, (batch, input_size), jnp.float32)
        lim1 = 1.0 / (input_size ** 0.5)
        lim2 = 1.0 / (hidden_size ** 0.5)
        w1 = jax.random.uniform(kw1, (input_size, hidden_size), jnp.float32, -lim1, lim1)
        b1 = jax.random.uniform(kb1, (hidden_size,), jnp.float32, -lim1, lim1)
        w2 = jax.random.uniform(kw2, (hidden_size, num_classes), jnp.float32, -lim2, lim2)
        b2 = jax.random.uniform(kb2, (num_classes,), jnp.float32, -lim2, lim2)
        return x, w1, b1, w2, b2

    def reference(x, w1, b1, w2, b2):
        h = jnp.maximum(x @ w1 + b1[None, :], 0.0)
        return h @ w2 + b2[None, :]

    k1, k2, k3 = jax.random.split(jax.random.PRNGKey(0), 3)

    # 1) Tiny demo shapes: f32, VMEM-resident weights, no feature padding,
    #    single batch tile, logical-width output.
    x, w1, b1, w2, b2 = make_problem(k1, 8, 32, 32, 16)
    ref = reference(x, w1, b1, w2, b2)
    params = prepare_params(w1, b1, w2, b2, compute_dtype=jnp.float32)
    out = jax.block_until_ready(simple_classifier(x, params))
    assert out.shape == (8, 16)
    assert jnp.allclose(out, ref, atol=1e-5, rtol=1e-5)

    # 2) bf16-matmul / f32-accumulate path (x and weights both bf16 on the MXU,
    #    hence the loose tolerance).
    params_bf16 = prepare_params(w1, b1, w2, b2, compute_dtype=jnp.bfloat16)
    out_bf16 = jax.block_until_ready(simple_classifier(x, params_bf16))
    assert out_bf16.shape == (8, 16)
    assert jnp.allclose(out_bf16, ref, atol=1e-1, rtol=1e-1)

    # 3) Batch tiling with minimal-waste padding (B=300, block_batch=256 ->
    #    two 152-row tiles, only 4 padded rows instead of 212).
    x3, w13, b13, w23, b23 = make_problem(k2, 300, 64, 64, 10)
    params3 = prepare_params(w13, b13, w23, b23)
    out3 = jax.block_until_ready(simple_classifier(x3, params3, block_batch=256))
    assert out3.shape == (300, 10)
    assert jnp.allclose(out3, reference(x3, w13, b13, w23, b23), atol=1e-4, rtol=1e-4)

    # 4) Reduction-tiled fallback over hidden (forced via h_tile=128).
    x4, w14, b14, w24, b24 = make_problem(k3, 64, 96, 512, 32)
    params4 = prepare_params(w14, b14, w24, b24, h_tile=128)
    out4 = jax.block_until_ready(simple_classifier(x4, params4))
    assert out4.shape == (64, 32)
    assert jnp.allclose(out4, reference(x4, w14, b14, w24, b24), atol=1e-4, rtol=1e-4)

    print("KERNEL_OK")
</pallas_src>

<mosaic_0001>
module attributes {stable_mosaic.version = 11 : i64} {
  func.func @_mlp_kernel_resident(%arg0: i32, %arg1: memref<8x32xf32, #tpu.memory_space<vmem>>, %arg2: memref<32x32xf32, #tpu.memory_space<vmem>>, %arg3: memref<1x32xf32, #tpu.memory_space<vmem>>, %arg4: memref<32x16xf32, #tpu.memory_space<vmem>>, %arg5: memref<1x16xf32, #tpu.memory_space<vmem>>, %arg6: memref<8x16xf32, #tpu.memory_space<vmem>>) attributes {dimension_semantics = [#tpu.dimension_semantics<parallel>], iteration_bounds = array<i64: 1>, scalar_prefetch = 0 : i64, scratch_operands = 0 : i64, tpu.core_type = #tpu.core_type<tc>, window_params = [{transform_indices = @transform_0, window_bounds = array<i64: 8, 32>}, {pipeline_mode = #tpu.pipeline_mode<synchronous>, transform_indices = @transform_1, window_bounds = array<i64: 32, 32>}, {pipeline_mode = #tpu.pipeline_mode<synchronous>, transform_indices = @transform_2, window_bounds = array<i64: 1, 32>}, {pipeline_mode = #tpu.pipeline_mode<synchronous>, transform_indices = @transform_3, window_bounds = array<i64: 32, 16>}, {pipeline_mode = #tpu.pipeline_mode<synchronous>, transform_indices = @transform_4, window_bounds = array<i64: 1, 16>}, {transform_indices = @transform_5, window_bounds = array<i64: 8, 16>}]} {
    %c0 = arith.constant 0 : index
    %c0_0 = arith.constant 0 : index
    %0 = vector.load %arg1[%c0, %c0_0] : memref<8x32xf32, #tpu.memory_space<vmem>>, vector<8x32xf32>
    %c0_1 = arith.constant 0 : index
    %c0_2 = arith.constant 0 : index
    %1 = vector.load %arg2[%c0_1, %c0_2] : memref<32x32xf32, #tpu.memory_space<vmem>>, vector<32x32xf32>
    %cst = arith.constant dense<0.000000e+00> : vector<8x32xf32>
    %2 = tpu.matmul %0, %1, %cst {dimension_numbers = #tpu.dot_dimension_numbers<[1], [0], [0], [1], [0, 0, 1, 1], [], []>} : vector<8x32xf32>, vector<32x32xf32>, vector<8x32xf32> -> vector<8x32xf32>
    %c0_3 = arith.constant 0 : index
    %c0_4 = arith.constant 0 : index
    %3 = vector.load %arg3[%c0_3, %c0_4] : memref<1x32xf32, #tpu.memory_space<vmem>>, vector<1x32xf32>
    %4 = vector.broadcast %3 : vector<1x32xf32> to vector<8x32xf32>
    %5 = arith.addf %2, %4 : vector<8x32xf32>
    %cst_5 = arith.constant 0.000000e+00 : f32
    %6 = vector.broadcast %cst_5 : f32 to vector<8x32xf32>
    %7 = arith.maximumf %5, %6 : vector<8x32xf32>
    %c0_6 = arith.constant 0 : index
    %c0_7 = arith.constant 0 : index
    %8 = vector.load %arg4[%c0_6, %c0_7] : memref<32x16xf32, #tpu.memory_space<vmem>>, vector<32x16xf32>
    %cst_8 = arith.constant dense<0.000000e+00> : vector<8x16xf32>
    %9 = tpu.matmul %7, %8, %cst_8 {dimension_numbers = #tpu.dot_dimension_numbers<[1], [0], [0], [1], [0, 0, 1, 1], [], []>} : vector<8x32xf32>, vector<32x16xf32>, vector<8x16xf32> -> vector<8x16xf32>
    %c0_9 = arith.constant 0 : index
    %c0_10 = arith.constant 0 : index
    %10 = vector.load %arg5[%c0_9, %c0_10] : memref<1x16xf32, #tpu.memory_space<vmem>>, vector<1x16xf32>
    %11 = vector.broadcast %10 : vector<1x16xf32> to vector<8x16xf32>
    %12 = arith.addf %9, %11 : vector<8x16xf32>
    %c0_11 = arith.constant 0 : index
    %c0_12 = arith.constant 0 : index
    %13 = vector.load %arg6[%c0_11, %c0_12] : memref<8x16xf32, #tpu.memory_space<vmem>>, vector<8x16xf32>
    tpu.vector_store %arg6[%c0_11, %c0_12], %12 {strides = array<i32>} : memref<8x16xf32, #tpu.memory_space<vmem>>, vector<8x16xf32>,
    return
  }
  func.func @transform_0(%arg0: i32) -> (i32, i32) {
    %c0_i32 = arith.constant 0 : i32
    %c0_i32_0 = arith.constant 0 : i32
    return %arg0, %c0_i32 : i32, i32
  }
  func.func @transform_1(%arg0: i32) -> (i32, i32) {
    %c0_i32 = arith.constant 0 : i32
    %c0_i32_0 = arith.constant 0 : i32
    %c0_i32_1 = arith.constant 0 : i32
    return %c0_i32, %c0_i32_0 : i32, i32
  }
  func.func @transform_2(%arg0: i32) -> (i32, i32) {
    %c0_i32 = arith.constant 0 : i32
    %c0_i32_0 = arith.constant 0 : i32
    %c0_i32_1 = arith.constant 0 : i32
    return %c0_i32, %c0_i32_0 : i32, i32
  }
  func.func @transform_3(%arg0: i32) -> (i32, i32) {
    %c0_i32 = arith.constant 0 : i32
    %c0_i32_0 = arith.constant 0 : i32
    %c0_i32_1 = arith.constant 0 : i32
    return %c0_i32, %c0_i32_0 : i32, i32
  }
  func.func @transform_4(%arg0: i32) -> (i32, i32) {
    %c0_i32 = arith.constant 0 : i32
    %c0_i32_0 = arith.constant 0 : i32
    %c0_i32_1 = arith.constant 0 : i32
    return %c0_i32, %c0_i32_0 : i32, i32
  }
  func.func @transform_5(%arg0: i32) -> (i32, i32) {
    %c0_i32 = arith.constant 0 : i32
    %c0_i32_0 = arith.constant 0 : i32
    return %arg0, %c0_i32 : i32, i32
  }
}

</mosaic_0001>

<bundles_post_ra>
// kernel: tpu_custom_call.1
= control target key start
LH: loop header
LB: loop body
LE: loop exit
PB: predicated region body
PF: predicated region fallthrough
CT: control target
= control target key end

     0   :  { %s202_s0 = inlined_call_operand.vmem [shape: f32[8,32], index: 0, kind: input, shape index: {}]   ;;  %s203_s1 = inlined_call_operand.vmem [shape: f32[32,32], index: 1, kind: input, shape index: {}]   ;;  %s204_s2 = inlined_call_operand.vmem [shape: f32[1,32], index: 2, kind: input, shape index: {}]   ;;  %s205_s3 = inlined_call_operand.vmem [shape: f32[32,16], index: 3, kind: input, shape index: {}]   ;;  %s206_s4 = inlined_call_operand.vmem [shape: f32[1,16], index: 4, kind: input, shape index: {}]   ;;  %s207_s5 = inlined_call_operand.hbm [shape: f32[8,16], index: 5, kind: output, shape index: {}]  }
   0x1   :  { %v25_v0 = vld [vmem:[%s203_s1 + $0x18] sm:$0xff]  ;;  %v24_v1 = vld [vmem:[%s203_s1 + $0x10] sm:$0xff]  ;;  %v23_v3 = vld [vmem:[%s203_s1 + $0x8] sm:$0xff] }
   0x2   :  { %46 = vmatpush.msra.mxu0 %v25_v0  ;;  %v58_v2 = vld [vmem:[%s205_s3 + $0x18] sm:$0xff] }
   0x3   :  { %78 = vmatpush.msra.mxu1 %v58_v2 }
   0x4   :  { %47 = vmatpush.msra.mxu0 %v24_v1 }
   0x5   :  { %10 = vsyncpa [#allocation3], 0  ;;  %v22_v4 = vld [vmem:[%s203_s1] sm:$0xff]  ;;  %vm30_vm0 = vcmask 261120   ;;  %v57_v6 = vld [vmem:[%s205_s3 + $0x10] sm:$0xff]  ;;  %s135_s13 = smov [#allocation2]  }
   0x6   :  { %48 = vmatpush.msra.mxu0 %v23_v3  ;;  %v21_v5 = vld [vmem:[%s202_s0] sm:$0xff]  ;;  %79 = vmatpush.msra.mxu1 %v57_v6  ;;  %v56_v7 = vld [vmem:[%s205_s3 + $0x8] sm:$0xff]  ;;  %s93_s14 = sshll.u32 %s135_s13, 4  ;;  %s95_s17 = sshll.u32 %s207_s5, 4  ;;  %vm86_vm1 = vcmask 130048   ;;  %s94_s14 = int_to_ptr.vmem [resolvable:$true] %s93_s14  ;;  %s96_s17 = int_to_ptr.hbm [resolvable:$true] %s95_s17 }
   0x7   :  { %v55_v8 = vld [vmem:[%s205_s3] sm:$0xff] }
   0x8   :  { %49 = vmatpush.msra.mxu0 %v22_v4  ;;  %80 = vmatpush.msra.mxu1 %v56_v7  ;;  %v107_v9 = vld [vmem:[%s204_s2] ss:$0 sm:$0xff] }
   0x9   :  { %104 = vmatmul.msk.f32.vlgmr.msra.gmra.mxu0 %vm30_vm0, %v21_v5  ;;  %v108_v13 = vld [vmem:[%s206_s4] ss:$0 sm:$0xff] }
   0xa   :  { %81 = vmatpush.msra.mxu1 %v55_v8 }
  0x86   :  { %v51_v10 = vpop.f32.mrf.mxu0 }
  0x87   :  { %v52_v11 = vadd.f32 %v107_v9, %v51_v10 }
  0x89   :  { %v54_v12 = vmax.f32 %v52_v11, 0.0 }
  0x8b   :  { %105 = vmatmul.msk.f32.vlgmr.msra.gmra.mxu1 %vm30_vm0, %v54_v12 }
 0x108   :  { %v83_v14 = vpop.f32.mrf.mxu1 }
 0x109   :  { %v84_v15 = vadd.f32 %v108_v13, %v83_v14 }
 0x10b   :  { %87 = vst.msk [vmem:[#allocation2] sm:$0xff] %vm86_vm1, %v84_v15 }
 0x10c   :  { %98 = dma.vmem_to_hbm [thread:$0]  %s94_s14, 128, %s96_s17, [#allocation3]  }
 0x10d   :  { %133 = dma.done.wait [#allocation3], 128  }
 0x10e   :  { %134 = vsyncadd [#allocation3], 4294967168 }
 0x10f   :  { %103 = vsyncpa [#allocation3], 1 }

</bundles_post_ra>
